<compile_context>
chip_gen: v5e
topology: v5e:2x2
jax: 0.10.0
libtpu: 0.0.40
codegen_flags: <defaults>
</compile_context>

<pallas_src>
import functools

import jax
import jax.numpy as jnp
from jax.experimental import pallas as pl
from jax.experimental.pallas import tpu as pltpu


def _round_up(x, m):
    return (x + m - 1) // m * m


def _choose_tm(M):
    return min(128, _round_up(M, 16))


def _choose_tk(K):
    return 256 if (K >= 512 and K % 256 == 0) else 128


def _choose_tn(N):
    return 256 if (N >= 512 and N % 256 == 0) else 128


# ----------------------------------------------------------------------------- Pallas kernels

def _matmul_kernel(a_ref, b_ref, bias_ref, o_ref, acc_ref, *, act, nk):
    k = pl.program_id(2)

    @pl.when(k == 0)
    def _():
        acc_ref[...] = jnp.zeros_like(acc_ref)

    acc_ref[...] += jnp.dot(a_ref[...], b_ref[...], preferred_element_type=jnp.float32)

    @pl.when(k == nk - 1)
    def _():
        r = acc_ref[...] + bias_ref[...]
        if act == 1:        # ReLU
            r = jnp.maximum(r, 0.0)
        elif act == 2:      # Sigmoid
            r = jax.nn.sigmoid(r)
        o_ref[...] = r.astype(o_ref.dtype)


def _matmul_res_kernel(a_ref, b_ref, bias_ref, r_ref, o_ref, acc_ref, *, act, nk):
    k = pl.program_id(2)

    @pl.when(k == 0)
    def _():
        acc_ref[...] = jnp.zeros_like(acc_ref)

    acc_ref[...] += jnp.dot(a_ref[...], b_ref[...], preferred_element_type=jnp.float32)

    @pl.when(k == nk - 1)
    def _():
        r = acc_ref[...] + bias_ref[...] + r_ref[...].astype(jnp.float32)
        if act == 1:
            r = jnp.maximum(r, 0.0)
        elif act == 2:
            r = jax.nn.sigmoid(r)
        o_ref[...] = r.astype(o_ref.dtype)


@functools.lru_cache(maxsize=None)
def _build_matmul(Mp, Kp, Np, act, tm, tn, tk, with_res):
    nk = Kp // tk
    kernel = functools.partial(_matmul_res_kernel if with_res else _matmul_kernel,
                               act=act, nk=nk)
    in_specs = [
        pl.BlockSpec((tm, tk), lambda i, j, k: (i, k)),   # activation (bf16)
        pl.BlockSpec((tk, tn), lambda i, j, k: (k, j)),   # weight (bf16, pre-padded)
        pl.BlockSpec((1, tn), lambda i, j, k: (0, j)),    # bias (f32, pre-padded)
    ]
    if with_res:
        in_specs.append(pl.BlockSpec((tm, tn), lambda i, j, k: (i, j)))  # residual (bf16)
    return pl.pallas_call(
        kernel,
        out_shape=jax.ShapeDtypeStruct((Mp, Np), jnp.bfloat16),
        grid_spec=pltpu.PrefetchScalarGridSpec(
            num_scalar_prefetch=0,
            grid=(Mp // tm, Np // tn, nk),
            in_specs=in_specs,
            out_specs=pl.BlockSpec((tm, tn), lambda i, j, k: (i, j)),
            scratch_shapes=[pltpu.VMEM((tm, tn), jnp.float32)],
        ),
        compiler_params=pltpu.CompilerParams(
            dimension_semantics=("parallel", "parallel", "arbitrary")),
    )


def _stack_max_kernel(x_ref, o_ref):
    o_ref[...] = jnp.max(x_ref[...], axis=0).astype(o_ref.dtype)


@functools.lru_cache(maxsize=None)
def _build_stack_max(KK, Mp, C, R):
    return pl.pallas_call(
        _stack_max_kernel,
        out_shape=jax.ShapeDtypeStruct((Mp, C), jnp.bfloat16),
        grid=(Mp // R,),
        in_specs=[pl.BlockSpec((KK, R, C), lambda i: (0, i, 0))],
        out_specs=pl.BlockSpec((R, C), lambda i: (i, 0)),
        compiler_params=pltpu.CompilerParams(dimension_semantics=("parallel",)),
    )


def _gap_kernel(x_ref, o_ref, *, nsteps, inv_hw):
    i = pl.program_id(0)

    @pl.when(i == 0)
    def _():
        o_ref[...] = jnp.zeros_like(o_ref)

    o_ref[...] += jnp.sum(x_ref[...].astype(jnp.float32), axis=1)

    @pl.when(i == nsteps - 1)
    def _():
        o_ref[...] = o_ref[...] * inv_hw


@functools.lru_cache(maxsize=None)
def _build_gap(N, HWp, C, R, inv_hw):
    nsteps = HWp // R
    return pl.pallas_call(
        functools.partial(_gap_kernel, nsteps=nsteps, inv_hw=inv_hw),
        out_shape=jax.ShapeDtypeStruct((N, C), jnp.float32),
        grid=(nsteps,),
        in_specs=[pl.BlockSpec((N, R, C), lambda i: (0, i, 0))],
        out_specs=pl.BlockSpec((N, C), lambda i: (0, 0)),
        compiler_params=pltpu.CompilerParams(dimension_semantics=("arbitrary",)),
    )


# ----------------------------------------------------------------------------- matmul wrapper

def prep_weight(w2d, bias):
    """Fold/reshape already done by caller; pad + cast ONCE here (bf16 weight, f32 bias)."""
    K, N = w2d.shape
    tk, tn = _choose_tk(K), _choose_tn(N)
    Kp, Np = _round_up(K, tk), _round_up(N, tn)
    wp = jnp.zeros((Kp, Np), jnp.bfloat16).at[:K, :N].set(w2d.astype(jnp.bfloat16))
    bp = jnp.zeros((1, Np), jnp.float32).at[0, :N].set(bias.astype(jnp.float32))
    return {"w": wp, "b": bp, "K": K, "N": N, "tk": tk, "tn": tn}


def matmul_prepped(a, wp, act=0, residual=None):
    """(M,K) @ pre-padded weight + bias, fused activation (0=none,1=relu,2=sigmoid),
    optional fused residual-add before activation."""
    M, K = a.shape
    Kp, Np = wp["w"].shape
    tm = _choose_tm(M)
    Mp = _round_up(M, tm)
    a = a.astype(jnp.bfloat16)
    if Mp != M or Kp != K:
        a = jnp.zeros((Mp, Kp), jnp.bfloat16).at[:M, :K].set(a)
    args = [a, wp["w"], wp["b"]]
    if residual is not None:
        r = residual.astype(jnp.bfloat16)
        if Mp != M or Np != wp["N"]:
            r = jnp.zeros((Mp, Np), jnp.bfloat16).at[:M, :wp["N"]].set(r)
        args.append(r)
    out = _build_matmul(Mp, Kp, Np, act, tm, wp["tn"], wp["tk"], residual is not None)(*args)
    return out[:M, :wp["N"]]


# ----------------------------------------------------------------------------- layer wrappers

def im2col(x, kh, kw, stride, pad):
    N, H, W, C = x.shape
    Ho = (H + 2 * pad - kh) // stride + 1
    Wo = (W + 2 * pad - kw) // stride + 1
    xp = jnp.pad(x, ((0, 0), (pad, pad), (pad, pad), (0, 0))) if pad else x
    cols = []
    for di in range(kh):
        for dj in range(kw):
            cols.append(xp[:, di:di + stride * (Ho - 1) + 1:stride,
                           dj:dj + stride * (Wo - 1) + 1:stride, :])
    return jnp.concatenate(cols, axis=-1), Ho, Wo


def conv2d_p(x, layer, residual=None):
    kh, kw, stride, pad = layer["kh"], layer["kw"], layer["stride"], layer["pad"]
    N = x.shape[0]
    if kh == 1 and kw == 1 and stride == 1 and pad == 0:
        patches, Ho, Wo = x, x.shape[1], x.shape[2]
    else:
        patches, Ho, Wo = im2col(x, kh, kw, stride, pad)
    res = None if residual is None else residual.reshape(N * Ho * Wo, layer["N"])
    y = matmul_prepped(patches.reshape(N * Ho * Wo, -1), layer, act=layer["act"], residual=res)
    return y.reshape(N, Ho, Wo, layer["N"])


def conv_transpose2x2_p(x, layer):
    N, H, W, cin = x.shape
    cout = layer["cout"]
    y = matmul_prepped(x.reshape(N * H * W, cin), layer, act=0)
    y = y.reshape(N, H, W, 2, 2, cout).transpose(0, 1, 3, 2, 4, 5)
    return y.reshape(N, 2 * H, 2 * W, cout)


def maxpool2d(x, k, stride, pad=0):
    N, H, W, C = x.shape
    Ho = (H + 2 * pad - k) // stride + 1
    Wo = (W + 2 * pad - k) // stride + 1
    NEG = -3e38
    xp = jnp.pad(x, ((0, 0), (pad, pad), (pad, pad), (0, 0)), constant_values=NEG) if pad else x
    views = [xp[:, di:di + stride * (Ho - 1) + 1:stride,
                dj:dj + stride * (Wo - 1) + 1:stride, :]
             for di in range(k) for dj in range(k)]
    stacked = jnp.stack(views, 0).reshape(k * k, N * Ho * Wo, C).astype(jnp.bfloat16)
    M = N * Ho * Wo
    R = min(512, _round_up(M, 16))
    Mp = _round_up(M, R)
    if Mp != M:
        stacked = jnp.pad(stacked, ((0, 0), (0, Mp - M), (0, 0)), constant_values=NEG)
    out = _build_stack_max(k * k, Mp, C, R)(stacked)
    return out[:M].reshape(N, Ho, Wo, C)


def global_avg_pool(x):
    N, H, W, C = x.shape
    HW = H * W
    R = min(512, _round_up(HW, 16))
    HWp = _round_up(HW, R)
    xr = x.reshape(N, HW, C).astype(jnp.bfloat16)
    if HWp != HW:
        xr = jnp.pad(xr, ((0, 0), (0, HWp - HW), (0, 0)))
    return _build_gap(N, HWp, C, R, float(1.0 / HW))(xr)


# ----------------------------------------------------------------------------- raw parameters

class Init:
    def __init__(self, seed=0):
        self._key = jax.random.PRNGKey(seed)

    def key(self):
        self._key, sub = jax.random.split(self._key)
        return sub


def conv_params(init, cin, cout, k):
    fan_in = cin * k * k
    w = jax.random.normal(init.key(), (k, k, cin, cout), jnp.float32) / jnp.sqrt(float(fan_in))
    return {"w": w, "b": jnp.zeros((cout,), jnp.float32)}


def convT_params(init, cin, cout):
    w = jax.random.normal(init.key(), (cin, 2, 2, cout), jnp.float32) / jnp.sqrt(float(cin * 4))
    return {"w": w, "b": jnp.zeros((cout,), jnp.float32)}


def bn_params(c):
    return {"gamma": jnp.ones((c,), jnp.float32), "beta": jnp.zeros((c,), jnp.float32),
            "mean": jnp.zeros((c,), jnp.float32), "var": jnp.ones((c,), jnp.float32),
            "eps": 1e-5}


def fold_bn(conv, bn):
    scale = bn["gamma"] / jnp.sqrt(bn["var"] + bn["eps"])
    return conv["w"] * scale, (conv["b"] - bn["mean"]) * scale + bn["beta"]


def double_conv_params(init, cin, cout):
    return {"c1": conv_params(init, cin, cout, 3), "bn1": bn_params(cout),
            "c2": conv_params(init, cout, cout, 3), "bn2": bn_params(cout)}


def bottleneck_params(init, inplanes, planes, stride):
    p = {"c1": conv_params(init, inplanes, planes, 1), "bn1": bn_params(planes),
         "c2": conv_params(init, planes, planes, 3), "bn2": bn_params(planes),
         "c3": conv_params(init, planes, planes * 4, 1), "bn3": bn_params(planes * 4),
         "stride": stride}
    if stride != 1 or inplanes != planes * 4:
        p["down"] = conv_params(init, inplanes, planes * 4, 1)
        p["down_bn"] = bn_params(planes * 4)
    return p


def resnet_params(init, cin, num_classes, layers=(3, 4, 6, 3)):
    p = {"conv1": conv_params(init, cin, 64, 7), "bn1": bn_params(64)}
    inplanes = 64
    for li, (planes, blocks, stride) in enumerate(zip((64, 128, 256, 512), layers, (1, 2, 2, 2))):
        layer = []
        for bi in range(blocks):
            layer.append(bottleneck_params(init, inplanes, planes, stride if bi == 0 else 1))
            inplanes = planes * 4
        p[f"layer{li + 1}"] = layer
    p["fc_w"] = jax.random.normal(init.key(), (512 * 4, num_classes), jnp.float32) / jnp.sqrt(2048.0)
    p["fc_b"] = jnp.zeros((num_classes,), jnp.float32)
    return p


def multitask_params(init, in_channels, out_channels, num_classes=10):
    p = {"conv1": double_conv_params(init, in_channels, 64),
         "conv2": double_conv_params(init, 64, 128),
         "conv3": double_conv_params(init, 128, 256),
         "conv4": double_conv_params(init, 256, 512)}
    for tag in ("a", "b"):
        p[f"up5{tag}"] = convT_params(init, 512, 256)
        p[f"conv6{tag}"] = double_conv_params(init, 512, 256)
        p[f"up6{tag}"] = convT_params(init, 256, 128)
        p[f"conv7{tag}"] = double_conv_params(init, 256, 128)
        p[f"up7{tag}"] = convT_params(init, 128, 64)
        p[f"conv8{tag}"] = double_conv_params(init, 128, 64)
        p[f"conv9{tag}"] = conv_params(init, 64, out_channels, 1)
    p["resnet"] = resnet_params(init, in_channels + 2 * out_channels, num_classes)
    return p


# ----------------------------------------------------------------------------- prep (fold BN, fuse decoders, pad weights)

def prep_conv(w_hwio, b, stride, pad, act):
    kh, kw, cin, cout = w_hwio.shape
    d = prep_weight(w_hwio.reshape(kh * kw * cin, cout), b)
    d.update(kh=kh, kw=kw, stride=stride, pad=pad, act=act)
    return d


def prep_convT(w, b):
    cin, _, _, cout = w.shape
    d = prep_weight(w.reshape(cin, 4 * cout), jnp.tile(b, 4))
    d["cout"] = cout
    return d


def fuse_shared_in(wa, ba, wb, bb):
    # both heads read the same input channels: concatenate along Cout
    return jnp.concatenate([wa, wb], axis=-1), jnp.concatenate([ba, bb])


def fuse_diag(wa, ba, wb, bb):
    # input = [a-channels | b-channels]; block-diagonal weight
    kh, kw, cin, cout = wa.shape
    w = jnp.zeros((kh, kw, 2 * cin, 2 * cout), jnp.float32)
    w = w.at[:, :, :cin, :cout].set(wa).at[:, :, cin:, cout:].set(wb)
    return w, jnp.concatenate([ba, bb])


def fuse_convT_diag(pa, pb):
    cin, _, _, cout = pa["w"].shape
    w = jnp.zeros((2 * cin, 2, 2, 2 * cout), jnp.float32)
    w = w.at[:cin, :, :, :cout].set(pa["w"]).at[cin:, :, :, cout:].set(pb["w"])
    return w, jnp.concatenate([pa["b"], pb["b"]])


def fuse_first(wa, ba, wb, bb, c_up):
    # fused input layout: [up_a(c_up), up_b(c_up), shared skip(c_skip)]
    kh, kw, cin, cout = wa.shape
    w = jnp.zeros((kh, kw, cin + c_up, 2 * cout), jnp.float32)
    w = w.at[:, :, :c_up, :cout].set(wa[:, :, :c_up, :])
    w = w.at[:, :, 2 * c_up:, :cout].set(wa[:, :, c_up:, :])
    w = w.at[:, :, c_up:2 * c_up, cout:].set(wb[:, :, :c_up, :])
    w = w.at[:, :, 2 * c_up:, cout:].set(wb[:, :, c_up:, :])
    return w, jnp.concatenate([ba, bb])


def prep_double_conv(p):
    w1, b1 = fold_bn(p["c1"], p["bn1"])
    w2, b2 = fold_bn(p["c2"], p["bn2"])
    return {"l1": prep_conv(w1, b1, 1, 1, 1), "l2": prep_conv(w2, b2, 1, 1, 1)}


def prep_double_conv_fused(pa, pb, c_up):
    wa1, ba1 = fold_bn(pa["c1"], pa["bn1"])
    wb1, bb1 = fold_bn(pb["c1"], pb["bn1"])
    w1, b1 = fuse_first(wa1, ba1, wb1, bb1, c_up)
    wa2, ba2 = fold_bn(pa["c2"], pa["bn2"])
    wb2, bb2 = fold_bn(pb["c2"], pb["bn2"])
    w2, b2 = fuse_diag(wa2, ba2, wb2, bb2)
    return {"l1": prep_conv(w1, b1, 1, 1, 1), "l2": prep_conv(w2, b2, 1, 1, 1)}


def prep_bottleneck(p):
    out = {}
    w, b = fold_bn(p["c1"], p["bn1"]); out["c1"] = prep_conv(w, b, 1, 0, 1)
    w, b = fold_bn(p["c2"], p["bn2"]); out["c2"] = prep_conv(w, b, p["stride"], 1, 1)
    w, b = fold_bn(p["c3"], p["bn3"]); out["c3"] = prep_conv(w, b, 1, 0, 1)  # relu after fused add
    if "down" in p:
        w, b = fold_bn(p["down"], p["down_bn"]); out["down"] = prep_conv(w, b, p["stride"], 0, 0)
    return out


def prep_resnet(p):
    out = {}
    w, b = fold_bn(p["conv1"], p["bn1"])
    out["conv1"] = prep_conv(w, b, 2, 3, 1)
    for li in range(4):
        out[f"layer{li + 1}"] = [prep_bottleneck(bp) for bp in p[f"layer{li + 1}"]]
    out["fc"] = prep_weight(p["fc_w"], p["fc_b"])
    return out


def prep_multitask(p, out_channels):
    P = {f"conv{i}": prep_double_conv(p[f"conv{i}"]) for i in range(1, 5)}
    w, b = fuse_shared_in(p["up5a"]["w"], p["up5a"]["b"], p["up5b"]["w"], p["up5b"]["b"])
    P["up5"] = prep_convT(w, b)
    P["conv6"] = prep_double_conv_fused(p["conv6a"], p["conv6b"], c_up=256)
    w, b = fuse_convT_diag(p["up6a"], p["up6b"]); P["up6"] = prep_convT(w, b)
    P["conv7"] = prep_double_conv_fused(p["conv7a"], p["conv7b"], c_up=128)
    w, b = fuse_convT_diag(p["up7a"], p["up7b"]); P["up7"] = prep_convT(w, b)
    P["conv8"] = prep_double_conv_fused(p["conv8a"], p["conv8b"], c_up=64)
    w9, b9 = fuse_diag(p["conv9a"]["w"], p["conv9a"]["b"], p["conv9b"]["w"], p["conv9b"]["b"])
    P["conv9"] = prep_conv(w9, b9, 1, 0, act=2)   # fused 1x1 conv + sigmoid for both heads
    P["resnet"] = prep_resnet(p["resnet"])
    P["out_channels"] = out_channels
    return P


# ----------------------------------------------------------------------------- forward

def double_conv_apply_p(dp, x):
    return conv2d_p(conv2d_p(x, dp["l1"]), dp["l2"])


def bottleneck_apply_p(bp, x):
    identity = conv2d_p(x, bp["down"]) if "down" in bp else x
    out = conv2d_p(x, bp["c1"])
    out = conv2d_p(out, bp["c2"])
    # residual add + ReLU fused into the 3rd conv's matmul epilogue
    return conv2d_p(out, bp["c3"], residual=identity)


def resnet_apply_p(rp, x):
    x = conv2d_p(x, rp["conv1"])
    x = maxpool2d(x, 3, 2, 1)
    for li in range(4):
        for bp in rp[f"layer{li + 1}"]:
            x = bottleneck_apply_p(bp, x)
    feature_map = x
    pooled = global_avg_pool(x)                      # (N, 2048) f32
    outc = matmul_prepped(pooled, rp["fc"], act=0)
    return outc, feature_map


def multitask_forward(P, x_nchw):
    oc = P["out_channels"]
    x = jnp.transpose(x_nchw, (0, 2, 3, 1)).astype(jnp.bfloat16)   # -> NHWC, bf16
    c1 = double_conv_apply_p(P["conv1"], x)
    p1 = maxpool2d(c1, 2, 2)
    c2 = double_conv_apply_p(P["conv2"], p1)
    p2 = maxpool2d(c2, 2, 2)
    c3 = double_conv_apply_p(P["conv3"], p2)
    p3 = maxpool2d(c3, 2, 2)
    c4 = double_conv_apply_p(P["conv4"], p3)

    # fused dual decoder: channel layout [head_a | head_b] everywhere
    up5 = conv_transpose2x2_p(c4, P["up5"])                              # 512 = [a256|b256]
    c5 = double_conv_apply_p(P["conv6"], jnp.concatenate([up5, c3], axis=-1))
    up6 = conv_transpose2x2_p(c5, P["up6"])                              # 256 = [a128|b128]
    c7 = double_conv_apply_p(P["conv7"], jnp.concatenate([up6, c2], axis=-1))
    up7 = conv_transpose2x2_p(c7, P["up7"])                              # 128 = [a64|b64]
    c8 = double_conv_apply_p(P["conv8"], jnp.concatenate([up7, c1], axis=-1))
    out_ab = conv2d_p(c8, P["conv9"])                                    # sigmoid, 2*oc channels
    outa = out_ab[..., :oc]
    outb = out_ab[..., oc:]

    class_inputs = jnp.concatenate([x, outa, outb], axis=-1)
    outc, feature_map = resnet_apply_p(P["resnet"], class_inputs)

    return (jnp.transpose(outa, (0, 3, 1, 2)).astype(jnp.float32),
            jnp.transpose(outb, (0, 3, 1, 2)).astype(jnp.float32),
            outc.astype(jnp.float32),
            jnp.transpose(feature_map, (0, 3, 1, 2)).astype(jnp.float32))


if __name__ == "__main__":
    in_channels, out_channels = 1, 1
    N, H, W = 2, 16, 16
    x = jax.random.normal(jax.random.PRNGKey(0), (N, in_channels, H, W), jnp.float32)

    init = Init(seed=0)
    raw = multitask_params(init, in_channels, out_channels, num_classes=10)
    params = prep_multitask(raw, out_channels)
    params = jax.block_until_ready(params)   # one-time weight fold/pad, outside the forward path

    outa, outb, outc, fmap = multitask_forward(params, x)
    jax.block_until_ready((outa, outb, outc, fmap))

    assert outa.shape == (N, out_channels, H, W)
    assert outb.shape == (N, out_channels, H, W)
    assert outc.shape == (N, 10)
    assert fmap.shape[1] == 2048
    assert bool(jnp.all(jnp.isfinite(outa))) and bool(jnp.all(jnp.isfinite(outb)))
    assert bool(jnp.all(jnp.isfinite(outc))) and bool(jnp.all(jnp.isfinite(fmap)))
    assert bool(jnp.all(outa >= 0)) and bool(jnp.all(outa <= 1))
    print("KERNEL_OK")
</pallas_src>

<mosaic_0001>
module attributes {stable_mosaic.version = 11 : i64} {
  func.func @_matmul_kernel(%arg0: i32, %arg1: i32, %arg2: i32, %arg3: memref<128x128xbf16, #tpu.memory_space<vmem>>, %arg4: memref<128x128xbf16, #tpu.memory_space<vmem>>, %arg5: memref<1x128xf32, #tpu.memory_space<vmem>>, %arg6: memref<128x128xbf16, #tpu.memory_space<vmem>>, %arg7: memref<128x128xf32, #tpu.memory_space<vmem>>) attributes {dimension_semantics = [#tpu.dimension_semantics<parallel>, #tpu.dimension_semantics<parallel>, #tpu.dimension_semantics<arbitrary>], iteration_bounds = array<i64: 4, 1, 1>, scalar_prefetch = 0 : i64, scratch_operands = 1 : i64, tpu.core_type = #tpu.core_type<tc>, window_params = [{transform_indices = @transform_0, window_bounds = array<i64: 128, 128>}, {transform_indices = @transform_1, window_bounds = array<i64: 128, 128>}, {transform_indices = @transform_2, window_bounds = array<i64: 1, 128>}, {transform_indices = @transform_3, window_bounds = array<i64: 128, 128>}]} {
    %c0_i32 = arith.constant 0 : i32
    %0 = arith.cmpi eq, %arg2, %c0_i32 : i32
    %1 = arith.extui %0 : i1 to i32
    %c0_i32_0 = arith.constant 0 : i32
    %2 = arith.cmpi ne, %1, %c0_i32_0 : i32
    scf.if %2 {
      %cst_10 = arith.constant 0.000000e+00 : f32
      %12 = vector.broadcast %cst_10 : f32 to vector<128x128xf32>
      %c0_11 = arith.constant 0 : index
      %c0_12 = arith.constant 0 : index
      %13 = vector.load %arg7[%c0_11, %c0_12] : memref<128x128xf32, #tpu.memory_space<vmem>>, vector<128x128xf32>
      tpu.vector_store %arg7[%c0_11, %c0_12], %12 {strides = array<i32>} : memref<128x128xf32, #tpu.memory_space<vmem>>, vector<128x128xf32>,
    } else {
    }
    %c0 = arith.constant 0 : index
    %c0_1 = arith.constant 0 : index
    %3 = vector.load %arg7[%c0, %c0_1] : memref<128x128xf32, #tpu.memory_space<vmem>>, vector<128x128xf32>
    %c0_2 = arith.constant 0 : index
    %c0_3 = arith.constant 0 : index
    %4 = vector.load %arg3[%c0_2, %c0_3] : memref<128x128xbf16, #tpu.memory_space<vmem>>, vector<128x128xbf16>
    %c0_4 = arith.constant 0 : index
    %c0_5 = arith.constant 0 : index
    %5 = vector.load %arg4[%c0_4, %c0_5] : memref<128x128xbf16, #tpu.memory_space<vmem>>, vector<128x128xbf16>
    %cst = arith.constant dense<0.000000e+00> : vector<128x128xf32>
    %6 = tpu.matmul %4, %5, %cst {dimension_numbers = #tpu.dot_dimension_numbers<[1], [0], [0], [1], [0, 0, 1, 1], [], []>} : vector<128x128xbf16>, vector<128x128xbf16>, vector<128x128xf32> -> vector<128x128xf32>
    %7 = arith.addf %3, %6 : vector<128x128xf32>
    %c0_6 = arith.constant 0 : index
    %c0_7 = arith.constant 0 : index
    %8 = vector.load %arg7[%c0_6, %c0_7] : memref<128x128xf32, #tpu.memory_space<vmem>>, vector<128x128xf32>
    tpu.vector_store %arg7[%c0_6, %c0_7], %7 {strides = array<i32>} : memref<128x128xf32, #tpu.memory_space<vmem>>, vector<128x128xf32>,
    %c0_i32_8 = arith.constant 0 : i32
    %9 = arith.cmpi eq, %arg2, %c0_i32_8 : i32
    %10 = arith.extui %9 : i1 to i32
    %c0_i32_9 = arith.constant 0 : i32
    %11 = arith.cmpi ne, %10, %c0_i32_9 : i32
    scf.if %11 {
      %c0_10 = arith.constant 0 : index
      %c0_11 = arith.constant 0 : index
      %12 = vector.load %arg7[%c0_10, %c0_11] : memref<128x128xf32, #tpu.memory_space<vmem>>, vector<128x128xf32>
      %c0_12 = arith.constant 0 : index
      %c0_13 = arith.constant 0 : index
      %13 = vector.load %arg5[%c0_12, %c0_13] : memref<1x128xf32, #tpu.memory_space<vmem>>, vector<1x128xf32>
      %14 = vector.broadcast %13 : vector<1x128xf32> to vector<128x128xf32>
      %15 = arith.addf %12, %14 : vector<128x128xf32>
      %cst_14 = arith.constant 0.000000e+00 : f32
      %16 = vector.broadcast %cst_14 : f32 to vector<128x128xf32>
      %17 = arith.maximumf %15, %16 : vector<128x128xf32>
      %18 = arith.truncf %17 : vector<128x128xf32> to vector<128x128xbf16>
      %c0_15 = arith.constant 0 : index
      %c0_16 = arith.constant 0 : index
      %19 = vector.load %arg6[%c0_15, %c0_16] : memref<128x128xbf16, #tpu.memory_space<vmem>>, vector<128x128xbf16>
      tpu.vector_store %arg6[%c0_15, %c0_16], %18 {strides = array<i32>} : memref<128x128xbf16, #tpu.memory_space<vmem>>, vector<128x128xbf16>,
    } else {
    }
    return
  }
  func.func @transform_0(%arg0: i32, %arg1: i32, %arg2: i32) -> (i32, i32) {
    %c0_i32 = arith.constant 0 : i32
    return %arg0, %arg2 : i32, i32
  }
  func.func @transform_1(%arg0: i32, %arg1: i32, %arg2: i32) -> (i32, i32) {
    %c0_i32 = arith.constant 0 : i32
    return %arg2, %arg1 : i32, i32
  }
  func.func @transform_2(%arg0: i32, %arg1: i32, %arg2: i32) -> (i32, i32) {
    %c0_i32 = arith.constant 0 : i32
    %c0_i32_0 = arith.constant 0 : i32
    return %c0_i32, %arg1 : i32, i32
  }
  func.func @transform_3(%arg0: i32, %arg1: i32, %arg2: i32) -> (i32, i32) {
    %c0_i32 = arith.constant 0 : i32
    return %arg0, %arg1 : i32, i32
  }
}

</mosaic_0001>

<bundles_post_ra>
// kernel: tpu_custom_call.1
= control target key start
LH: loop header
LB: loop body
LE: loop exit
PB: predicated region body
PF: predicated region fallthrough
CT: control target
= control target key end

     0   :  { %s1326_s0 = inlined_call_operand.hbm [shape: bf16[512,128], index: 0, kind: input, shape index: {}]   ;;  %s1327_s1 = inlined_call_operand.hbm [shape: bf16[128,128], index: 1, kind: input, shape index: {}]   ;;  %s1328_s2 = inlined_call_operand.vmem [shape: f32[1,128], index: 2, kind: input, shape index: {}]   ;;  %s1329_s3 = inlined_call_operand.hbm [shape: bf16[512,128], index: 3, kind: output, shape index: {}]  }
   0x1   :  { %1331 = sst [smem:[#allocation12_spill]] %s1327_s1 }
   0x2   :  { %8 = vsyncpa [#allocation4], 0 }
   0x3   :  { %10 = vsyncpa [#allocation4 + $0x1], 0 }
   0x4   :  { %11 = vsyncpa [#allocation7], 0 }
   0x5   :  { %12 = vsyncpa [#allocation5], 0 }
   0x6   :  { %14 = vsyncpa [#allocation5 + $0x1], 0  ;;  %s1145_s12 = smov 0   ;;  %s1147_s13 = smov 0  }
   0x7   :  { %s1149_s14 = smov 0   ;;  %s1151_s15 = smov 0  }
   0x8   :  { %s1153_s16 = smov 0   ;;  %s1155_s17 = smov 0  }
   0x9 LB: > { %s723_s18 = sadd.s32 4294967295, %s1118_s17   ;;  %s724_s19 = sadd.s32 4294967294, %s1118_s17   ;;  %s1118_s17 = sphi %s1155_s17, %s20_s17   ;;  %s1114_s16 = sphi %s1153_s16, %s1345_s16   ;;  %s1110_s15 = sphi %s1151_s15, %s1344_s15   ;;  %s1106_s14 = sphi %s1149_s14, %s1343_s14   ;;  %s1102_s13 = sphi %s1147_s13, %s1342_s13   ;;  %s1098_s12 = sphi %s1145_s12, %s1341_s12  }
   0xa   : > { %p61_p0 = scmp.ne.s32.totalorder %s1102_s13, %s1098_s12  ;;  %p1179_p1 = scmp.eq.s32.totalorder %s723_s18, 0 }
   0xb   : > { %p1183_p2 = scmp.eq.s32.totalorder %s723_s18, 3  ;;  %p147_p3 = scmp.eq.s32.totalorder %s724_s19, 3 }
   0xc   : > { %p1189_p4 = por %p1179_p1, %p61_p0  ;;  %p725_p5 = scmp.ge.s32.totalorder %s1118_s17, 1 }
   0xd   : > { %p1194_p6 = por %p147_p3, %p61_p0  ;;  %p154_p7 = scmp.lt.s32.totalorder %s1118_s17, 5 }
   0xe   : > { %s1336_s1 = sld [smem:[#allocation12_spill]]  ;;  %s1120_s28 = smov [#allocation6]  }
   0xf   : > { %p1202_p8 = pnand %p725_p5, %p154_p7  ;;  %s171_s29 = sshll.u32 %s1120_s28, 4  ;;  %s172_s29 = int_to_ptr.vmem [resolvable:$true] %s171_s29 }
  0x10   : > { %s1330_s30 = smov 64   ;;  %s1122_s4 = smov 4  }
  0x11   : > { %p902_p9 = pneg %p1202_p8  ;;  %s39_s5 = sadd.s32 1, %s1114_s16 }
  0x12   : > { %p41_p11 = scmp.ge.s32.totalorder %s39_s5, 4  ;;  %s48_s6 = sadd.s32 1, %s1106_s14 }
  0x13   : > { %p903_p10 = pnand %p902_p9, %p1179_p1  ;;  %p55_p12 = scmp.ne.s32.totalorder %s1106_s14, %s1102_s13 }
  0x14   : > { %s169_s26 = sshll.u32 %s1336_s1, 4  ;;  %p56_p13 = scmp.eq.s32.totalorder %s1118_s17, 0  ;;  %s170_s26 = int_to_ptr.hbm [resolvable:$true] %s169_s26 }
  0x15   : > { %905 = dma.hbm_to_vmem [thread:$0]  (!%p903_p10), %s170_s26, 1024, %s172_s29, [#allocation7], %s1330_s30, %s1330_s30, %s1122_s4  }
  0x16   : > { %s1347_s5 = smov (%p41_p11, %s39_s5), 0  ;;  %p1220_p0 = por %p56_p13, %p55_p12 }
  0x17   : > { %p1226_p3 = por %p1183_p2, %p55_p12  ;;  %s43_s9 = ssub.s32 %s1114_s16, %s1347_s5 }
  0x18   : > { %p915_p5 = scmp.lt.s32.totalorder %s1118_s17, 4  ;;  %p46_p7 = scmp.eq.s32.totalorder %s43_s9, 0 }
  0x19   : > { %s191_s10 = sand.u32 1, %s1106_s14   ;;  %s805_s19 = sshll.u32 %s1114_s16, 6 }
  0x1a   : > { %s729_s11 = sshll.u32 %s191_s10, 6  ;;  %s201_s26 = scalar_lea.hbm %s1326_s0, %s805_s19 }
  0x1b   : > { %s1235_s18 = scalar_select %p46_p7, %s1106_s14, %s48_s6  }
  0x1c   : > { %s195_s28 = scalar_lea.vmem [#allocation3], %s729_s11  ;;  %s202_s21 = sshll.u32 %s201_s26, 4  ;;  %s203_s21 = int_to_ptr.hbm [resolvable:$true] %s202_s21 }
  0x1d   : > { %s204_s29 = sshll.u32 %s195_s28, 4  ;;  %p907_p2 = pnand %p915_p5, %p1220_p0  ;;  %s205_s29 = int_to_ptr.vmem [resolvable:$true] %s204_s29 }
  0x1e   : > { %s192_s30 = scalar_lea.sflag [#allocation4], %s191_s10  ;;  %s1340_s1 = smov 64  }
  0x1f   : > { %909 = dma.hbm_to_vmem [thread:$0]  (!%p907_p2), %s203_s21, 1024, %s205_s29, %s192_s30, %s1340_s1, %s1340_s1, %s1122_s4  }
  0x20   : > { %216 = sbr.rel (%p1202_p8) target bundleno = 240 (0xf0), region = 32  ;;  %s1249_s6 = sand.u32 (!%p1202_p8), 1, %s1102_s13  }
  0x21   : > { %s733_s9 = sshll.u32 (!%p1202_p8), %s1249_s6, 6  ;;  %s219_s11 = scalar_lea.sflag (!%p1202_p8), [#allocation4], %s1249_s6 }
  0x22   : > { %s1255_s7 = scalar_lea.vmem (!%p1202_p8), [#allocation3], %s733_s9 }
  0x25   : > { %1085 = dma.done.wait (%p1189_p4), %s219_s11, 1024  }
  0x26   : > { %1087 = vsyncadd (%p1189_p4), %s219_s11, 4294966272 }
  0x27   : > { %1089 = dma.done.wait (%p1179_p1), [#allocation7], 1024  }
  0x28   : > { %1091 = vsyncadd (%p1179_p1), [#allocation7], 4294966272  ;;  %v821_v0 = vld [vmem:[#allocation6 + $0x38] sm:$0xff]  ;;  %v820_v1 = vld [vmem:[#allocation6 + $0x30] sm:$0xff]  ;;  %s1278_s22 = scalar_lea.vmem [#allocation8], %s733_s9  ;;  %s822_s27 = sshll.u32 %s1110_s15, 6 }
  0x29   : > { %424 = vmatpush.bf16.msra.mxu0 %v821_v0  ;;  %870 = vmatpush.bf16.msra.mxu1 %v821_v0  ;;  %v819_v2 = vld [vmem:[#allocation6 + $0x28] sm:$0xff]  ;;  %v818_v3 = vld [vmem:[#allocation6 + $0x20] sm:$0xff]  ;;  %v817_v4 = vld [vmem:[#allocation6 + $0x18] sm:$0xff]  ;;  %s605_s10 = scalar_lea.hbm %s1329_s3, %s822_s27  ;;  %s606_s19 = sshll.u32 %s1278_s22, 4  ;;  %s607_s19 = int_to_ptr.vmem [resolvable:$true] %s606_s19 }
  0x2a   : > { %871 = vmatpush.bf16.msra.mxu2 %v821_v0  ;;  %872 = vmatpush.bf16.msra.mxu3 %v821_v0  ;;  %v816_v5 = vld [vmem:[#allocation6 + $0x10] sm:$0xff]  ;;  %v815_v6 = vld [vmem:[#allocation6 + $0x8] sm:$0xff]  ;;  %v814_v7 = vld [vmem:[#allocation6] sm:$0xff]  ;;  %s608_s24 = sshll.u32 %s605_s10, 4  ;;  %s593_s15 = scalar_lea.sflag [#allocation5], %s1249_s6  ;;  %s609_s24 = int_to_ptr.hbm [resolvable:$true] %s608_s24 }
  0x2b   : > { %v806_v8 = vld [vmem:[%s1255_s7] sm:$0xff]  ;;  %v808_v9 = vld [vmem:[%s1255_s7 + $0x10] sm:$0xff]  ;;  %v807_v12 = vld [vmem:[%s1255_s7 + $0x8] sm:$0xff]  ;;  %s1046_s25 = sshra.s32 %s609_s24, 4  ;;  %s1052_s21 = scalar_lea.hbm %s1329_s3, 256  ;;  %s1047_s25 = int_to_ptr.hbm [resolvable:$true] %s1046_s25 }
  0x2c   : > { %v810_v10 = vld [vmem:[%s1255_s7 + $0x20] sm:$0xff]  ;;  %v812_v11 = vld [vmem:[%s1255_s7 + $0x30] sm:$0xff]  ;;  %v809_v13 = vld [vmem:[%s1255_s7 + $0x18] sm:$0xff]  ;;  %s1048_s26 = scalar_lea.hbm %s1047_s25, 64  ;;  %p1053_p9 = scmp.lt.s32.totalorder %s1047_s25, %s1329_s3 }
  0x2d   : > { %425 = vmatpush.bf16.msra.mxu0 %v820_v1  ;;  %873 = vmatpush.bf16.msra.mxu1 %v820_v1  ;;  %v811_v14 = vld [vmem:[%s1255_s7 + $0x28] sm:$0xff]  ;;  %v813_v15 = vld [vmem:[%s1255_s7 + $0x38] sm:$0xff]  ;;  %v971_v18 = vld [vmem:[%s1328_s2] ss:$0 sm:$0xff]  ;;  %p1049_p1 = scmp.ne.s32.totalorder %s1047_s25, %s1048_s26  ;;  %p1054_p10 = scmp.lt.s32.totalorder %s1052_s21, %s1048_s26 }
  0x2e   : > { %874 = vmatpush.bf16.msra.mxu2 %v820_v1  ;;  %875 = vmatpush.bf16.msra.mxu3 %v820_v1 }
  0x2f   : > { %p1050_p4 = pnand %p1049_p1, %p1226_p3  ;;  %p1055_p11 = por %p1054_p10, %p1053_p9 }
  0x31   : > { %426 = vmatpush.bf16.msra.mxu0 %v819_v2  ;;  %876 = vmatpush.bf16.msra.mxu1 %v819_v2  ;;  %p1051_p8 = pneg %p1050_p4 }
  0x32   : > { %877 = vmatpush.bf16.msra.mxu2 %v819_v2  ;;  %878 = vmatpush.bf16.msra.mxu3 %v819_v2 }
  0x33   : > { %p1056_p12 = pnand %p1055_p11, %p1051_p8 }
  0x35   : > { %427 = vmatpush.bf16.msra.mxu0 %v818_v3  ;;  %879 = vmatpush.bf16.msra.mxu1 %v818_v3 }
  0x36   : > { %880 = vmatpush.bf16.msra.mxu2 %v818_v3  ;;  %881 = vmatpush.bf16.msra.mxu3 %v818_v3 }
  0x39   : > { %428 = vmatpush.bf16.msra.mxu0 %v817_v4  ;;  %882 = vmatpush.bf16.msra.mxu1 %v817_v4 }
  0x3a   : > { %883 = vmatpush.bf16.msra.mxu2 %v817_v4  ;;  %884 = vmatpush.bf16.msra.mxu3 %v817_v4 }
  0x3d   : > { %429 = vmatpush.bf16.msra.mxu0 %v816_v5  ;;  %885 = vmatpush.bf16.msra.mxu1 %v816_v5 }
  0x3e   : > { %886 = vmatpush.bf16.msra.mxu2 %v816_v5  ;;  %887 = vmatpush.bf16.msra.mxu3 %v816_v5 }
  0x41   : > { %430 = vmatpush.bf16.msra.mxu0 %v815_v6  ;;  %888 = vmatpush.bf16.msra.mxu1 %v815_v6 }
  0x42   : > { %889 = vmatpush.bf16.msra.mxu2 %v815_v6  ;;  %890 = vmatpush.bf16.msra.mxu3 %v815_v6 }
  0x45   : > { %431 = vmatpush.bf16.msra.mxu0 %v814_v7  ;;  %891 = vmatpush.bf16.msra.mxu1 %v814_v7 }
  0x46   : > { %892 = vmatpush.bf16.msra.mxu2 %v814_v7  ;;  %893 = vmatpush.bf16.msra.mxu3 %v814_v7 }
  0x48   : > { %432 = vmatmul.bf16.vlgmr.msra.gmra.mxu0 %v806_v8  ;;  %442 = vmatmul.bf16.vlgmr.msra.gmra.mxu1 %v808_v9 }
  0x49   : > { %452 = vmatmul.bf16.vlgmr.msra.gmra.mxu2 %v810_v10  ;;  %462 = vmatmul.bf16.vlgmr.msra.gmra.mxu3 %v812_v11 }
  0x58   : > { %437 = vmatmul.bf16.gmra.mxu0 %v807_v12  ;;  %447 = vmatmul.bf16.gmra.mxu1 %v809_v13 }
  0x59   : > { %457 = vmatmul.bf16.gmra.mxu2 %v811_v14  ;;  %467 = vmatmul.bf16.gmra.mxu3 %v813_v15 }
  0xc5   : > { %v433_v16 = vpop.f32.mrf.mxu0  ;;  %v443_v17 = vpop.f32.mrf.mxu1 }
  0xc6   : > { %v528_v19 = vadd.f32 %v971_v18, %v433_v16  ;;  %v532_v20 = vadd.f32 %v971_v18, %v443_v17 }
  0xc8   : > { %v544_v27 = vmax.f32 %v528_v19, 0.0  ;;  %v548_v28 = vmax.f32 %v532_v20, 0.0 }
  0xcc   : > { %v453_v21 = vpop.f32.mrf.mxu2  ;;  %v463_v22 = vpop.f32.mrf.mxu3 }
  0xcd   : > { %v435_v23 = vpop.f32.mrf.mxu0  ;;  %v445_v24 = vpop.f32.mrf.mxu1  ;;  %v536_v33 = vadd.f32 %v971_v18, %v453_v21  ;;  %v540_v34 = vadd.f32 %v971_v18, %v463_v22 }
  0xce   : > { %v529_v25 = vadd.f32 %v971_v18, %v435_v23  ;;  %v533_v26 = vadd.f32 %v971_v18, %v445_v24 }
  0xcf   : > { %v552_v41 = vmax.f32 %v536_v33, 0.0  ;;  %v556_v42 = vmax.f32 %v540_v34, 0.0 }
  0xd0   : > { %v545_v29 = vmax.f32 %v529_v25, 0.0  ;;  %v549_v30 = vmax.f32 %v533_v26, 0.0 }
  0xd2   : > { %v826_v31 = vpack.c.bf16 %v545_v29, %v544_v27  ;;  %v836_v32 = vpack.c.bf16 %v549_v30, %v548_v28 }
  0xd4   : > { %827 = vst [vmem:[%s1278_s22] sm:$0xff] %v826_v31   ;;  %v455_v35 = vpop.f32.mrf.mxu2  ;;  %v465_v36 = vpop.f32.mrf.mxu3 }
  0xd5   : > { %864 = vst [vmem:[%s1278_s22 + $0x10] sm:$0xff] %v836_v32   ;;  %v537_v37 = vadd.f32 %v971_v18, %v455_v35  ;;  %v541_v38 = vadd.f32 %v971_v18, %v465_v36  ;;  %v438_v39 = vpop.f32.mrf.mxu0  ;;  %v448_v40 = vpop.f32.mrf.mxu1 }
  0xd6   : > { %v530_v47 = vadd.f32 %v971_v18, %v438_v39  ;;  %v534_v48 = vadd.f32 %v971_v18, %v448_v40 }
  0xd7   : > { %v553_v43 = vmax.f32 %v537_v37, 0.0  ;;  %v557_v44 = vmax.f32 %v541_v38, 0.0 }
  0xd8   : > { %v546_v55 = vmax.f32 %v530_v47, 0.0  ;;  %v550_v56 = vmax.f32 %v534_v48, 0.0 }
  0xd9   : > { %v846_v45 = vpack.c.bf16 %v553_v43, %v552_v41  ;;  %v856_v46 = vpack.c.bf16 %v557_v44, %v556_v42 }
  0xdb   : > { %866 = vst [vmem:[%s1278_s22 + $0x20] sm:$0xff] %v846_v45  }
  0xdc   : > { %868 = vst [vmem:[%s1278_s22 + $0x30] sm:$0xff] %v856_v46   ;;  %v458_v49 = vpop.f32.mrf.mxu2  ;;  %v468_v50 = vpop.f32.mrf.mxu3 }
  0xdd   : > { %v440_v51 = vpop.f32.mrf.mxu0  ;;  %v450_v52 = vpop.f32.mrf.mxu1  ;;  %v538_v61 = vadd.f32 %v971_v18, %v458_v49  ;;  %v542_v62 = vadd.f32 %v971_v18, %v468_v50 }
  0xde   : > { %v531_v53 = vadd.f32 %v971_v18, %v440_v51  ;;  %v535_v54 = vadd.f32 %v971_v18, %v450_v52 }
  0xdf   : > { %v554_v3 = vmax.f32 %v538_v61, 0.0  ;;  %v558_v4 = vmax.f32 %v542_v62, 0.0 }
  0xe0   : > { %v547_v57 = vmax.f32 %v531_v53, 0.0  ;;  %v551_v58 = vmax.f32 %v535_v54, 0.0 }
  0xe2   : > { %v831_v59 = vpack.c.bf16 %v547_v57, %v546_v55  ;;  %v841_v60 = vpack.c.bf16 %v551_v58, %v550_v56 }
  0xe4   : > { %863 = vst [vmem:[%s1278_s22 + $0x8] sm:$0xff] %v831_v59   ;;  %v460_v63 = vpop.f32.mrf.mxu2  ;;  %v470_v0 = vpop.f32.mrf.mxu3 }
  0xe5   : > { %865 = vst [vmem:[%s1278_s22 + $0x18] sm:$0xff] %v841_v60   ;;  %v539_v1 = vadd.f32 %v971_v18, %v460_v63  ;;  %v543_v2 = vadd.f32 %v971_v18, %v470_v0 }
  0xe7   : > { %v555_v5 = vmax.f32 %v539_v1, 0.0  ;;  %v559_v6 = vmax.f32 %v543_v2, 0.0 }
  0xe9   : > { %v851_v7 = vpack.c.bf16 %v555_v5, %v554_v3  ;;  %v861_v8 = vpack.c.bf16 %v559_v6, %v558_v4 }
  0xeb   : > { %867 = vst [vmem:[%s1278_s22 + $0x28] sm:$0xff] %v851_v7  }
  0xec   : > { %869 = vst [vmem:[%s1278_s22 + $0x38] sm:$0xff] %v861_v8  }
  0xed   : > { %1059 = shalt.err (!%p1056_p12)
}
  0xee   : > { %s1123_s6 = smov 64   ;;  %s1124_s7 = smov 4  }
  0xef   : > { %900 = dma.vmem_to_hbm [thread:$0]  (%p1226_p3), %s607_s19, 1024, %s609_s24, %s593_s15, %s1123_s6, %s1123_s6, %s1124_s7  }
  0xf0 PF: > { %p917_p13 = scmp.ge.s32.totalorder %s1118_s17, 2  ;;  %s623_s1 = sand.u32 1, %s1098_s12  }
  0xf1   : > { %s624_s20 = scalar_lea.sflag [#allocation5], %s623_s1 }
  0xf2   : > { %p911_p0 = pnand %p917_p13, %p1194_p6 }
  0xf4   : > { %p912_p5 = pneg %p911_p0 }
  0xf6   : > { %1093 = dma.done.wait (%p912_p5), %s624_s20, 1024  }
  0xf7   : > { %1095 = vsyncadd (%p912_p5), %s624_s20, 4294966272  ;;  %s20_s17 = sadd.s32 1, %s1118_s17   ;;  %s1341_s12 = smov %s1102_s13 }
  0xf8   : > { %p17_p7 = scmp.ge.s32.totalorder %s20_s17, 6   ;;  %s1342_s13 = smov %s1106_s14 }
  0xf9   : > { %s1343_s14 = smov %s1235_s18  ;;  %s1344_s15 = smov %s1114_s16 }
  0xfa   : > { %s1345_s16 = smov %s1347_s5  ;;  %19 = sbr.rel (!%p17_p7) target bundleno = 9 (0x9), region = 93 }
  0xff   :  { %630 = vsyncpa [#allocation4], 1 }
 0x100   :  { %632 = vsyncpa [#allocation4 + $0x1], 1 }
 0x101   :  { %633 = vsyncpa [#allocation7], 1 }
 0x102   :  { %634 = vsyncpa [#allocation5], 1 }
 0x103   :  { %636 = vsyncpa [#allocation5 + $0x1], 1 }

</bundles_post_ra>
